<compile_context>
chip_gen: v7x
topology: tpu7x:2x2x1
jax: 0.10.0
libtpu: 0.0.40
codegen_flags: <defaults>
</compile_context>

<pallas_src>
import functools

import jax
import jax.numpy as jnp
from jax.experimental import pallas as pl
from jax.experimental.pallas import tpu as pltpu


_SEQ_BUFFER_BUDGET = 4 * 1024 * 1024    # bytes per seq buffer (double-buffered)
_VMEM_LIMIT = 32 * 1024 * 1024          # scoped VMEM limit, portable v5e/v6e/v7x


def _choose_tiles(B, N, H, itemsize):
    """Pick (tile_n, tile_h) for the (B, N, H) stream."""
    # H axis: split into two 128-aligned tiles when possible so the leading
    # "parallel" grid axis exposes >= 2 blocks (one per v7x TensorCore).
    tile_h = H // 2 if (H % 256 == 0) else H

    # Node axis: biggest tile that divides N, respects the sublane packing
    # granularity for the dtype, and keeps the double-buffered seq stream
    # inside the VMEM budget (also leaves headroom on v7x's 64 MiB VMEM).
    gran = {4: 8, 2: 16, 1: 32}.get(itemsize, 8)
    target = _SEQ_BUFFER_BUDGET // max(1, B * tile_h * itemsize)
    target = max(gran, min(4096, target))
    if N <= target:
        return N, tile_h
    cand = (min(target, N) // gran) * gran
    while cand >= gran and N % cand != 0:
        cand -= gran
    if cand >= gran:
        return cand, tile_h
    # TODO(synk): pad N to a tileable size instead of taking the whole axis
    # when N is large and has no suitable divisor (keeps VMEM bounded).
    return N, tile_h


def _mean_readout_kernel(seq_ref, o_ref, acc_ref, *, inv_n):
    """Unmasked path: o = mean(seq, axis=1); node reduction over grid axis 1."""
    k = pl.program_id(1)

    @pl.when(k == 0)
    def _init():
        acc_ref[...] = jnp.zeros_like(acc_ref)

    # (B, tile_n, tile_h) -> f32 partial sum over the node tile.
    acc_ref[...] += jnp.sum(seq_ref[...].astype(jnp.float32), axis=1)

    @pl.when(k == pl.num_programs(1) - 1)
    def _finalize():
        o_ref[...] = (acc_ref[...] * inv_n).astype(o_ref.dtype)


def _masked_readout_kernel(seq_ref, msk_ref, inv_ref, o_ref, acc_ref):
    """Masked path: o = sum(seq * msk, axis=1) * (1 / sum(msk))."""
    k = pl.program_id(1)

    @pl.when(k == 0)
    def _init():
        acc_ref[...] = jnp.zeros_like(acc_ref)

    s = seq_ref[...].astype(jnp.float32)      # (B, tile_n, tile_h)
    m = msk_ref[...]                          # (B, tile_n, 1), already f32
    acc_ref[...] += jnp.sum(s * m, axis=1)

    @pl.when(k == pl.num_programs(1) - 1)
    def _finalize():
        # 1/sum(msk) was computed once in the wrapper and lives in SMEM:
        # a single multiply instead of a per-element divide.
        o_ref[...] = (acc_ref[...] * inv_ref[0]).astype(o_ref.dtype)


def avg_readout(seq, msk=None):
    """Pallas implementation of AvgReadout.forward."""
    if seq.ndim == 2:
        # (N, H) case: reduce dim 0 -> (H,)
        return avg_readout(seq[None], msk)[0]

    assert seq.ndim == 3, "AvgReadout expects (B, N, H) or (N, H)"
    B, N, H = seq.shape
    tile_n, tile_h = _choose_tiles(B, N, H, seq.dtype.itemsize)
    grid = (H // tile_h, N // tile_n)

    seq_spec = pl.BlockSpec((B, tile_n, tile_h), lambda h, k: (0, k, h))
    out_spec = pl.BlockSpec((B, tile_h), lambda h, k: (0, h))
    out_shape = jax.ShapeDtypeStruct((B, H), seq.dtype)
    scratch = [pltpu.VMEM((B, tile_h), jnp.float32)]
    cparams = pltpu.CompilerParams(
        dimension_semantics=("parallel", "arbitrary"),
        vmem_limit_bytes=_VMEM_LIMIT,
    )

    if msk is None:
        kernel = functools.partial(_mean_readout_kernel, inv_n=1.0 / N)
        return pl.pallas_call(
            kernel,
            out_shape=out_shape,
            grid_spec=pltpu.PrefetchScalarGridSpec(
                num_scalar_prefetch=0,
                grid=grid,
                in_specs=[seq_spec],
                out_specs=out_spec,
                scratch_shapes=scratch,
            ),
            compiler_params=cparams,
        )(seq)

    # ---- masked path ----
    msk = jnp.asarray(msk, jnp.float32)       # bool/int masks become float
    total = jnp.sum(msk)                      # torch.sum(msk) on the original mask
    inv = jnp.reshape(1.0 / total, (1,)).astype(jnp.float32)

    if msk.size == B * N:
        msk = jnp.reshape(msk, (B, N, 1))
    elif msk.size == N:
        msk = jnp.broadcast_to(jnp.reshape(msk, (1, N, 1)), (B, N, 1))
    else:
        raise ValueError(f"mask of size {msk.size} incompatible with seq {seq.shape}")

    msk_spec = pl.BlockSpec((B, tile_n, 1), lambda h, k: (0, k, 0))
    inv_spec = pl.BlockSpec(memory_space=pltpu.MemorySpace.SMEM)

    return pl.pallas_call(
        _masked_readout_kernel,
        out_shape=out_shape,
        grid_spec=pltpu.PrefetchScalarGridSpec(
            num_scalar_prefetch=0,
            grid=grid,
            in_specs=[seq_spec, msk_spec, inv_spec],
            out_specs=out_spec,
            scratch_shapes=scratch,
        ),
        compiler_params=cparams,
    )(seq, msk, inv)


if __name__ == "__main__":
    key = jax.random.PRNGKey(0)
    k1, k2 = jax.random.split(key)

    B, N, H = 2, 16, 32
    seq = jax.random.normal(k1, (B, N, H), dtype=jnp.float32)
    msk = (jax.random.uniform(k2, (B, N, 1)) > 0.3).astype(jnp.float32)

    # --- unmasked path: mean over node axis ---
    out_mean = jax.block_until_ready(avg_readout(seq))
    ref_mean = jnp.mean(seq, axis=1)
    assert out_mean.shape == (B, H)
    assert jnp.allclose(out_mean, ref_mean, atol=1e-5, rtol=1e-5)

    # --- masked path: sum(seq * msk, 1) / sum(msk) ---
    out_msk = jax.block_until_ready(avg_readout(seq, msk))
    ref_msk = jnp.sum(seq * msk, axis=1) / jnp.sum(msk)
    assert out_msk.shape == (B, H)
    assert jnp.allclose(out_msk, ref_msk, atol=1e-5, rtol=1e-5)

    print("KERNEL_OK")
</pallas_src>

<mosaic_0001>
module attributes {stable_mosaic.version = 11 : i64} {
  func.func @_mean_readout_kernel(%arg0: i32, %arg1: i32, %arg2: memref<2x16x32xf32, #tpu.memory_space<vmem>>, %arg3: memref<2x32xf32, #tpu.memory_space<vmem>>, %arg4: memref<2x32xf32, #tpu.memory_space<vmem>>) attributes {dimension_semantics = [#tpu.dimension_semantics<parallel>, #tpu.dimension_semantics<arbitrary>], iteration_bounds = array<i64: 1, 1>, scalar_prefetch = 0 : i64, scratch_operands = 1 : i64, tpu.core_type = #tpu.core_type<tc>, window_params = [{transform_indices = @transform_0, window_bounds = array<i64: 2, 16, 32>}, {transform_indices = @transform_1, window_bounds = array<i64: 2, 32>}]} {
    %c0_i32 = arith.constant 0 : i32
    %0 = arith.cmpi eq, %arg1, %c0_i32 : i32
    %1 = arith.extui %0 : i1 to i32
    %c0_i32_0 = arith.constant 0 : i32
    %2 = arith.cmpi ne, %1, %c0_i32_0 : i32
    scf.if %2 {
      %cst_9 = arith.constant 0.000000e+00 : f32
      %11 = vector.broadcast %cst_9 : f32 to vector<2x32xf32>
      %c0_10 = arith.constant 0 : index
      %c0_11 = arith.constant 0 : index
      %12 = vector.load %arg4[%c0_10, %c0_11] : memref<2x32xf32, #tpu.memory_space<vmem>>, vector<2x32xf32>
      tpu.vector_store %arg4[%c0_10, %c0_11], %11 {strides = array<i32>} : memref<2x32xf32, #tpu.memory_space<vmem>>, vector<2x32xf32>,
    } else {
    }
    %c0 = arith.constant 0 : index
    %c0_1 = arith.constant 0 : index
    %3 = vector.load %arg4[%c0, %c0_1] : memref<2x32xf32, #tpu.memory_space<vmem>>, vector<2x32xf32>
    %c0_2 = arith.constant 0 : index
    %c0_3 = arith.constant 0 : index
    %c0_4 = arith.constant 0 : index
    %4 = vector.load %arg2[%c0_2, %c0_3, %c0_4] : memref<2x16x32xf32, #tpu.memory_space<vmem>>, vector<2x16x32xf32>
    %cst = arith.constant dense<0.000000e+00> : vector<2x32xf32>
    %5 = vector.multi_reduction <add>, %4, %cst [1] : vector<2x16x32xf32> to vector<2x32xf32>
    %6 = arith.addf %3, %5 : vector<2x32xf32>
    %c0_5 = arith.constant 0 : index
    %c0_6 = arith.constant 0 : index
    %7 = vector.load %arg4[%c0_5, %c0_6] : memref<2x32xf32, #tpu.memory_space<vmem>>, vector<2x32xf32>
    tpu.vector_store %arg4[%c0_5, %c0_6], %6 {strides = array<i32>} : memref<2x32xf32, #tpu.memory_space<vmem>>, vector<2x32xf32>,
    %c0_i32_7 = arith.constant 0 : i32
    %8 = arith.cmpi eq, %arg1, %c0_i32_7 : i32
    %9 = arith.extui %8 : i1 to i32
    %c0_i32_8 = arith.constant 0 : i32
    %10 = arith.cmpi ne, %9, %c0_i32_8 : i32
    scf.if %10 {
      %c0_9 = arith.constant 0 : index
      %c0_10 = arith.constant 0 : index
      %11 = vector.load %arg4[%c0_9, %c0_10] : memref<2x32xf32, #tpu.memory_space<vmem>>, vector<2x32xf32>
      %cst_11 = arith.constant 6.250000e-02 : f32
      %12 = vector.broadcast %cst_11 : f32 to vector<2x32xf32>
      %13 = arith.mulf %11, %12 : vector<2x32xf32>
      %c0_12 = arith.constant 0 : index
      %c0_13 = arith.constant 0 : index
      %14 = vector.load %arg3[%c0_12, %c0_13] : memref<2x32xf32, #tpu.memory_space<vmem>>, vector<2x32xf32>
      tpu.vector_store %arg3[%c0_12, %c0_13], %13 {strides = array<i32>} : memref<2x32xf32, #tpu.memory_space<vmem>>, vector<2x32xf32>,
    } else {
    }
    return
  }
  func.func @transform_0(%arg0: i32, %arg1: i32) -> (i32, i32, i32) {
    %c0_i32 = arith.constant 0 : i32
    %c0_i32_0 = arith.constant 0 : i32
    return %c0_i32, %arg1, %arg0 : i32, i32, i32
  }
  func.func @transform_1(%arg0: i32, %arg1: i32) -> (i32, i32) {
    %c0_i32 = arith.constant 0 : i32
    %c0_i32_0 = arith.constant 0 : i32
    return %c0_i32, %arg0 : i32, i32
  }
}

</mosaic_0001>

<bundles_post_ra>
// kernel: tpu_custom_call.1
= control target key start
LH: loop header
LB: loop body
LE: loop exit
PB: predicated region body
PF: predicated region fallthrough
CT: control target
= control target key end

     0   :  { %6 = vsyncpa [#allocation4], 0  ;;  %s177_s0 = inlined_call_operand.hbm [shape: f32[2,16,32], index: 0, kind: input, shape index: {}]   ;;  %s178_s1 = inlined_call_operand.hbm [shape: f32[2,32], index: 1, kind: output, shape index: {}]  }
   0x1   :  { %7 = vsyncpa [#allocation5], 0  ;;  %s135_s6 = smov [#allocation3]   ;;  %s87_s10 = scalar_lea.hbm %s177_s0, 512 }
   0x2   :  { %s13_s7 = sshll.u32 %s135_s6, 4  ;;  %p88_p0 = scmp.ne.s32.totalorder %s177_s0, %s87_s10  ;;  %s14_s7 = int_to_ptr.vmem [resolvable:$true] %s13_s7 }
   0x3   :  { %p91_p1 = scmp.lt.u32.totalorder %s87_s10, %s177_s0 }
   0x5   :  { %p93_p2 = pnand %p91_p1, %p88_p0 }
   0x7   :  { %96 = shalt.err (!%p93_p2)
}
   0x8   :  { %s97_s15 = scalar_lea.vmem %s14_s7, 512  ;;  %p102_p4 = scmp.lt.s32.totalorder %s14_s7, %s14_s7 }
   0x9   :  { %p98_p3 = scmp.ne.s32.totalorder %s14_s7, %s97_s15  ;;  %p103_p5 = scmp.lt.s32.totalorder %s97_s15, %s97_s15 }
   0xb   :  { %p104_p6 = por %p103_p5, %p102_p4 }
   0xd   :  { %p105_p7 = pnand %p104_p6, %p98_p3 }
   0xf   :  { %108 = shalt.err (!%p105_p7)
}
  0x10   :  { %s136_s16 = smov 128   ;;  %s137_s17 = smov 8  }
  0x11   :  { %19 = dma.hbm_to_vmem [thread:$0]  %s177_s0, 512, %s14_s7, [#allocation4], %s136_s16, %s136_s16, %s137_s17  }
  0x12   :  { %131 = dma.done.wait [#allocation4], 512  }
  0x13   :  { %132 = vsyncadd [#allocation4], 4294966784  ;;  %vm27_vm0 = vcmask 254976   ;;  %v138_v0 = vmov 0.0   ;;  %vm34_vm1 = vcmask 261120   ;;  %v30_v1 = vld [vmem:[#allocation3] sm:$0xff] }
  0x14   :  { %28 = vst.msk [vmem:[#allocation2] sm:$0x3] %vm27_vm0, %v138_v0  ;;  %v31_v2 = vld [vmem:[#allocation3 + $0x8] sm:$0xff]  ;;  %v32_v3 = vld [vmem:[#allocation3 + $0x10] sm:$0xff]  ;;  %v33_v4 = vld [vmem:[#allocation3 + $0x18] sm:$0xff]  ;;  %v35_v5 = vsel %vm34_vm1, %v30_v1, 0.0 }
  0x15   :  { %v36_v6 = vsel %vm34_vm1, %v31_v2, 0.0  ;;  %v44_v7 = vsel %vm34_vm1, %v32_v3, 0.0  ;;  %v45_v9 = vsel %vm34_vm1, %v33_v4, 0.0  ;;  %vm55_vm2 = vcmask 1041409   ;;  %s139_s0 = smov [#allocation6]  }
  0x16   :  { %v37_v8 = vadd.f32 %v36_v6, %v35_v5  ;;  %v46_v10 = vadd.f32 %v45_v9, %v44_v7  ;;  %s73_s20 = sshll.u32 %s139_s0, 4  ;;  %s74_s20 = int_to_ptr.vmem [resolvable:$true] %s73_s20 }
  0x17   :  { %s109_s21 = scalar_lea.vmem %s74_s20, 32  ;;  %p114_p9 = scmp.lt.s32.totalorder %s74_s20, %s74_s20 }
  0x18   :  { %v38_v11 = vrot.slane %v37_v8, 4  ;;  %v47_v12 = vrot.slane %v46_v10, 4  ;;  %p110_p8 = scmp.ne.s32.totalorder %s74_s20, %s109_s21  ;;  %p115_p10 = scmp.lt.s32.totalorder %s109_s21, %s109_s21 }
  0x1a   :  { %v39_v13 = vadd.f32 %v38_v11, %v37_v8  ;;  %v48_v14 = vadd.f32 %v47_v12, %v46_v10  ;;  %p116_p11 = por %p115_p10, %p114_p9 }
  0x1b   :  { %v29_v22 = vld [vmem:[#allocation2] sm:$0x3] }
  0x1c   :  { %v40_v15 = vrot.slane %v39_v13, 2  ;;  %v49_v16 = vrot.slane %v48_v14, 2  ;;  %p117_p12 = pnand %p116_p11, %p110_p8 }
  0x1e   :  { %v41_v17 = vadd.f32 %v40_v15, %v39_v13  ;;  %v50_v18 = vadd.f32 %v49_v16, %v48_v14 }
  0x20   :  { %v42_v19 = vrot.slane %v41_v17, 1  ;;  %v51_v20 = vrot.slane %v50_v18, 1 }
  0x22   :  { %v43_v21 = vadd.f32 %v42_v19, %v41_v17  ;;  %v52_v23 = vadd.f32 %v51_v20, %v50_v18 }
  0x24   :  { %v56_v24 = vsel %vm55_vm2, %v52_v23, %v43_v21 }
  0x25   :  { %v58_v25 = vadd.f32 %v56_v24, %v29_v22 }
  0x27   :  { %60 = vst.msk [vmem:[#allocation2] sm:$0x3] %vm27_vm0, %v58_v25 }
  0x2e   :  { %v64_v26 = vld [vmem:[#allocation2] sm:$0x3] }
  0x2f   :  { %v65_v27 = vmul.f32 0.0625, %v64_v26 }
  0x31   :  { %66 = vst.msk [vmem:[#allocation6] sm:$0x3] %vm27_vm0, %v65_v27 }
  0x32   :  { %120 = shalt.err (!%p117_p12)
}
  0x33   :  { %s121_s24 = scalar_lea.hbm %s178_s1, 32 }
  0x34   :  { %p122_p13 = scmp.ne.s32.totalorder %s178_s1, %s121_s24  ;;  %p125_p0 = scmp.lt.u32.totalorder %s121_s24, %s178_s1 }
  0x36   :  { %p127_p1 = pnand %p125_p0, %p122_p13 }
  0x38   :  { %130 = shalt.err (!%p127_p1)
}
  0x39   :  { %76 = dma.vmem_to_hbm [thread:$0]  %s74_s20, 32, %s178_s1, [#allocation5]  }
  0x3a   :  { %133 = dma.done.wait [#allocation5], 32  }
  0x3b   :  { %134 = vsyncadd [#allocation5], 4294967264 }
  0x3c   :  { %80 = vsyncpa [#allocation4], 1 }
  0x3d   :  { %81 = vsyncpa [#allocation5], 1 }

</bundles_post_ra>
